<compile_context>
chip_gen: v5e
topology: v5e:2x2
jax: 0.10.0
libtpu: 0.0.40
codegen_flags: <defaults>
</compile_context>

<pallas_src>
import functools

import jax
import jax.numpy as jnp
from jax.experimental import pallas as pl
from jax.experimental.pallas import tpu as pltpu

_LANES = 128        # vreg lane width: last dim of every tile
_SUBLANES = 8       # sublane granularity for the second-to-last dim
_MAX_BLOCK_ROWS = 512   # 512 x 128 x 4B = 256 KiB per buffer -> safe on v7x VMEM


def _identity_kernel(x_ref, o_ref):
    # TODO(synk): Loss.forward body is `pass` (returns None); there is no loss
    # computation to translate.  This kernel is a tiled identity copy used
    # only by the __main__ smoke test.
    o_ref[...] = x_ref[...]


def _tiling_for(n_elems):
    """Pick (padded_rows, block_rows) for a lane-dense (rows, 128) slab."""
    rows = pl.cdiv(n_elems, _LANES)
    rows = pl.cdiv(rows, _SUBLANES) * _SUBLANES          # sublane-aligned
    block_rows = min(_MAX_BLOCK_ROWS, rows)
    rows = pl.cdiv(rows, block_rows) * block_rows        # full tiles only
    return rows, block_rows


@functools.partial(jax.jit, static_argnames=())
def _run_pallas_identity(x):
    """Identity copy of `x` through a tiled, pipelined Pallas kernel."""
    orig_shape = x.shape
    flat = x.reshape(-1)
    n = flat.shape[0]
    rows, block_rows = _tiling_for(n)
    padded = rows * _LANES
    if padded != n:
        flat = jnp.pad(flat, (0, padded - n))
    x2d = flat.reshape(rows, _LANES)

    out2d = pl.pallas_call(
        _identity_kernel,
        out_shape=jax.ShapeDtypeStruct((rows, _LANES), x2d.dtype),
        grid=(rows // block_rows,),
        in_specs=[pl.BlockSpec((block_rows, _LANES), lambda i: (i, 0))],
        out_specs=pl.BlockSpec((block_rows, _LANES), lambda i: (i, 0)),
        # Output aliases the (intermediate) input slab: no fresh HBM
        # allocation, write stream folds onto the read stream.
        input_output_aliases={0: 0},
        compiler_params=pltpu.CompilerParams(
            dimension_semantics=("parallel",),
        ),
    )(x2d)

    return out2d.reshape(-1)[:n].reshape(orig_shape)


def loss_forward(input, target):
    """Exact semantic equivalent of Loss.forward: computes nothing, returns None."""
    # Per the perf review: the reference forward is a no-op, so no kernel is
    # launched here — launching one would be 100% discarded HBM traffic.
    del input, target
    return None


if __name__ == "__main__":
    key = jax.random.PRNGKey(0)
    k1, k2 = jax.random.split(key)

    # Small shapes consistent with a loss over NCHW feature maps.
    B, C, H, W = 2, 4, 16, 16
    x = jax.random.normal(k1, (B, C, H, W), dtype=jnp.float32)
    t = jax.random.normal(k2, (B, C, H, W), dtype=jnp.float32)

    # Smoke test: run the (single-input, aliased, tiled) identity kernel once.
    out = _run_pallas_identity(x)
    jax.block_until_ready(out)
    assert out.shape == x.shape
    assert jnp.allclose(out, x), "identity kernel mismatch"

    # Faithful forward semantics (returns None, like the PyTorch stub) with
    # zero kernel work on the forward path.
    result = loss_forward(x, t)
    assert result is None

    print("KERNEL_OK")
</pallas_src>

<mosaic_0001>
module attributes {stable_mosaic.version = 11 : i64} {
  func.func @_identity_kernel(%arg0: i32, %arg1: memref<16x128xf32, #tpu.memory_space<vmem>>, %arg2: memref<16x128xf32, #tpu.memory_space<vmem>>) attributes {dimension_semantics = [#tpu.dimension_semantics<parallel>], iteration_bounds = array<i64: 1>, scalar_prefetch = 0 : i64, scratch_operands = 0 : i64, tpu.core_type = #tpu.core_type<tc>, window_params = [{transform_indices = @transform_0, window_bounds = array<i64: 16, 128>}, {transform_indices = @transform_1, window_bounds = array<i64: 16, 128>}]} {
    %c0 = arith.constant 0 : index
    %c0_0 = arith.constant 0 : index
    %0 = vector.load %arg1[%c0, %c0_0] : memref<16x128xf32, #tpu.memory_space<vmem>>, vector<16x128xf32>
    %c0_1 = arith.constant 0 : index
    %c0_2 = arith.constant 0 : index
    %1 = vector.load %arg2[%c0_1, %c0_2] : memref<16x128xf32, #tpu.memory_space<vmem>>, vector<16x128xf32>
    tpu.vector_store %arg2[%c0_1, %c0_2], %0 {strides = array<i32>} : memref<16x128xf32, #tpu.memory_space<vmem>>, vector<16x128xf32>,
    return
  }
  func.func @transform_0(%arg0: i32) -> (i32, i32) {
    %c0_i32 = arith.constant 0 : i32
    %c0_i32_0 = arith.constant 0 : i32
    return %arg0, %c0_i32 : i32, i32
  }
  func.func @transform_1(%arg0: i32) -> (i32, i32) {
    %c0_i32 = arith.constant 0 : i32
    %c0_i32_0 = arith.constant 0 : i32
    return %arg0, %c0_i32 : i32, i32
  }
}

</mosaic_0001>

<bundles_post_ra>
// kernel: _run_pallas_identity.1
= control target key start
LH: loop header
LB: loop body
LE: loop exit
PB: predicated region body
PF: predicated region fallthrough
CT: control target
= control target key end

     0   :  { %s38_s0 = inlined_call_operand.vmem [shape: f32[16,128], index: 0, kind: input, shape index: {}, may-alias: {0,1}]   ;;  %s39_s1 = inlined_call_operand.vmem [shape: f32[16,128], index: 1, kind: output, shape index: {}, may-alias: {0,1}]  }
   0x1   :  { %v8_v0 = vld [vmem:[%s38_s0] sm:$0xff]  ;;  %v9_v1 = vld [vmem:[%s38_s0 + $0x8] sm:$0xff] }
   0x2   :  { %10 = vst [vmem:[%s39_s1] sm:$0xff] %v8_v0 }
   0x3   :  { %11 = vst [vmem:[%s39_s1 + $0x8] sm:$0xff] %v9_v1 }

</bundles_post_ra>
